<compile_context>
chip_gen: v5e
topology: v5e:2x2
jax: 0.10.0
libtpu: 0.0.40
codegen_flags: <defaults>
</compile_context>

<pallas_src>
import functools
import math

import jax
import jax.numpy as jnp
from jax.experimental import pallas as pl
from jax.experimental.pallas import tpu as pltpu

_HALF_LOG_2PI = 0.9189385332046727  # 0.5 * log(2*pi)


def _dar1_kernel(x_ref, loc_ref, istd_ref, istd_head_ref, const_ref,
                 out_ref, acc_ref, carry_ref, *, D, tL, L, HW, multi_tile):
    """One (batch-tile, lane-tile) grid step.

    x_ref:         (tB, tL)  lane-dense slab of the flattened (B, T*D) trajectory.
    loc_ref:       (tB, tL)  drift, tiled with period D (resident block).
    istd_ref:      (tB, tL)  1/std tiled with period D; lanes < D zeroed so the
                             interior accumulate needs no masking (resident).
    istd_head_ref: (tB, HW)  un-zeroed 1/std for the cross-tile boundary fix-up.
    const_ref:     (1,)      SMEM: -(T-1)*sum(log std) - 0.5*(T-1)*D*log(2pi).
    out_ref:       (tB, 1)   per-trial rw_term.
    acc_ref:       (tB, 1)   VMEM accumulator of sum(z^2).
    carry_ref:     (tB, HW)  VMEM carry of the previous tile's last HW lanes.
    """
    j = pl.program_id(1)
    nl = pl.num_programs(1)

    @pl.when(j == 0)
    def _init():
        acc_ref[...] = jnp.zeros_like(acc_ref)

    x = x_ref[...].astype(jnp.float32)                      # (tB, tL)
    loc = loc_ref[...]
    istd = istd_ref[...]
    rolled = pltpu.roll(x, shift=D, axis=1)                 # rolled[:, l] = x[:, (l - D) % tL]
    z = (x - rolled - loc) * istd                           # lanes < D -> exactly 0
    zsq = z * z

    # Interior tiles: unmasked accumulate (no iota / compare / select per element).
    @pl.when(j < nl - 1)
    def _interior():
        acc_ref[...] += jnp.sum(zsq, axis=1, keepdims=True)

    # Last tile (also covers the single-tile case): mask the possibly ragged tail
    # and the first-D boundary lanes explicitly (robust to garbage padding lanes).
    @pl.when(j == nl - 1)
    def _last():
        lane = jax.lax.broadcasted_iota(jnp.int32, zsq.shape, 1)
        valid = (lane >= D) & ((j * tL + lane) < L)
        acc_ref[...] += jnp.sum(jnp.where(valid, zsq, 0.0), axis=1, keepdims=True)

    if multi_tile:
        # Cross-tile boundary fix-up: the first D lanes of this tile pair with the
        # last D lanes of the previous tile, held in the small carry slab.
        @pl.when(j > 0)
        def _boundary():
            prev = pltpu.roll(carry_ref[...], shift=D, axis=1)   # lanes < D = prev tile tail
            zb = (x[:, :HW] - prev - loc[:, :HW]) * istd_head_ref[...]
            lane_h = jax.lax.broadcasted_iota(jnp.int32, zb.shape, 1)
            acc_ref[...] += jnp.sum(jnp.where(lane_h < D, zb * zb, 0.0),
                                    axis=1, keepdims=True)

        carry_ref[...] = x[:, tL - HW:]                     # hand tail to next tile

    out_ref[...] = (-0.5 * acc_ref[...] + const_ref[0]).astype(out_ref.dtype)


def dar1_log_p(x, loc, std, *, lane_tile=None, batch_tile=None):
    """dAR1.log_p(x, initial=False) for topo='euclid'.  x: (B, T, D); returns (B,)."""
    B, T, D = x.shape
    L = T * D
    itemsize = jnp.dtype(x.dtype).itemsize

    # Parameter pipeline matching the torch module: finv_std = lf_inv(std) at init,
    # softplus(finv_std) in forward.  Tiny (D,) math, done in the wrapper.
    finv_std = jnp.where(std > 30.0, std, jnp.log(jnp.expm1(std)))
    std_eff = jax.nn.softplus(finv_std).astype(jnp.float32)
    inv_std = 1.0 / std_eff
    log_std = jnp.log(std_eff)
    loc32 = loc.astype(jnp.float32)

    # Batch tile: dtype-aware sublane packing (8 f32 / 16 bf16 / 32 int8-fp8).
    if batch_tile is None:
        sub = max(8, 32 // max(itemsize, 1))
        tB = B if B <= sub else sub
    else:
        tB = batch_tile

    # Lane tile: single block for small problems, otherwise ~2 MiB of x per grid
    # step (per-step DMA large vs. the ~0.35us step overhead), aligned to
    # lcm(128, D) so the period-D parameter tiling lines up in every tile.
    lane_unit = (128 * D) // math.gcd(128, D)
    if lane_tile is None:
        target = max(lane_unit, (2 << 20) // max(tB * itemsize, 1))
        tL = L if L <= target else max(lane_unit, (target // lane_unit) * lane_unit)
    else:
        tL = lane_tile
    assert tL == L or (tL % 128 == 0 and tL % D == 0), \
        "lane tile must be 128- and D-aligned (or cover the whole T*D axis)"

    nB = pl.cdiv(B, tB)
    nL = pl.cdiv(L, tL)
    multi_tile = nL > 1
    HW = max(128, ((D + 127) // 128) * 128)        # carry / halo width (lanes)

    x_flat = x.reshape(B, L)                       # zero-copy; keeps input dtype

    # Resident parameter slabs, pre-broadcast to (tB, ...) so the kernel does no
    # sublane broadcasts.  istd has its first D lanes zeroed: those lanes have no
    # in-tile transition and are handled by the masked / fix-up paths instead.
    reps = tL // D
    loc_row = jnp.tile(loc32, reps)
    istd_row = jnp.tile(inv_std, reps).at[:D].set(0.0)
    loc_tile = jnp.broadcast_to(loc_row[None, :], (tB, tL))
    istd_tile = jnp.broadcast_to(istd_row[None, :], (tB, tL))
    head_reps = -(-HW // D)                        # ceil(HW / D)
    istd_head = jnp.broadcast_to(jnp.tile(inv_std, head_reps)[None, :HW], (tB, HW))

    const = (-(T - 1) * jnp.sum(log_std)
             - (T - 1) * D * _HALF_LOG_2PI).reshape(1).astype(jnp.float32)

    kernel = functools.partial(_dar1_kernel, D=D, tL=tL, L=L, HW=HW,
                               multi_tile=multi_tile)

    # Explicit VMEM budget: double-buffered x + resident params + scratch, with
    # headroom; matters on v5e (16 MiB scoped default), capped for v7x's 64 MiB.
    vmem_est = (2 * tB * tL * itemsize + 4 * tB * tL * 4
                + 2 * tB * HW * 4 + tB * (HW + 1) * 4 + (2 << 20))
    vmem_limit = int(min(max(vmem_est, 32 << 20), 64 << 20))

    out = pl.pallas_call(
        kernel,
        out_shape=jax.ShapeDtypeStruct((B, 1), jnp.float32),
        grid=(nB, nL),
        in_specs=[
            pl.BlockSpec((tB, tL), lambda b, j: (b, j)),            # x (lane-dense)
            pl.BlockSpec((tB, tL), lambda b, j: (0, 0)),            # loc (resident)
            pl.BlockSpec((tB, tL), lambda b, j: (0, 0)),            # 1/std, boundary-zeroed
            pl.BlockSpec((tB, HW), lambda b, j: (0, 0)),            # 1/std halo head
            pl.BlockSpec(memory_space=pltpu.MemorySpace.SMEM),      # scalar constant
        ],
        out_specs=pl.BlockSpec((tB, 1), lambda b, j: (b, 0)),
        scratch_shapes=[
            pltpu.VMEM((tB, 1), jnp.float32),      # sum(z^2) accumulator
            pltpu.VMEM((tB, HW), jnp.float32),     # previous-tile tail carry
        ],
        compiler_params=pltpu.CompilerParams(
            dimension_semantics=("parallel", "arbitrary"),
            vmem_limit_bytes=vmem_limit),
        cost_estimate=pl.CostEstimate(
            flops=5 * B * max(T - 1, 0) * D,
            transcendentals=0,
            bytes_accessed=x.size * itemsize + 12 * tB * tL + 4 * B),
    )(x_flat, loc_tile, istd_tile, istd_head, const)
    return out[:, 0]


def dar1_log_p_ref(x, loc, std):
    """Pure-JAX reference mirroring the PyTorch module (topo='euclid', initial=False)."""
    finv_std = jnp.where(std > 30.0, std, jnp.log(jnp.expm1(std)))
    std_eff = jax.nn.softplus(finv_std)                     # (D,)
    xf = x.astype(jnp.float32)
    mu = xf[:, :-1, :] + loc[None, None, :]
    tgt = xf[:, 1:, :]
    z = (tgt - mu) / std_eff[None, None, :]
    lp = -0.5 * z * z - jnp.log(std_eff)[None, None, :] - _HALF_LOG_2PI
    return lp.sum(axis=(1, 2))


if __name__ == "__main__":
    B, T, D = 2, 96, 4   # trials, timesteps, latent dims  (T*D = 384 lanes)

    key = jax.random.PRNGKey(0)
    x = jax.random.normal(key, (B, T, D), dtype=jnp.float32)

    # Deterministic parameter init (per-dim drift / positive std).
    loc = 0.05 * jnp.arange(D, dtype=jnp.float32)
    std = 0.3 + 0.1 * jnp.arange(D, dtype=jnp.float32)

    ref = jax.block_until_ready(dar1_log_p_ref(x, loc, std))

    # Default tiling (single lane block for this small problem).
    out1 = jax.block_until_ready(dar1_log_p(x, loc, std))
    # Forced multi-tile path: exercises the lane grid, tail carry and fix-up.
    out2 = jax.block_until_ready(dar1_log_p(x, loc, std, lane_tile=128))
    # bf16 input path (in-kernel upcast; no wrapper-side cast / HBM copy).
    x_bf = x.astype(jnp.bfloat16)
    ref_bf = jax.block_until_ready(dar1_log_p_ref(x_bf, loc, std))
    out3 = jax.block_until_ready(dar1_log_p(x_bf, loc, std, lane_tile=128))

    assert out1.shape == (B,) and out2.shape == (B,) and out3.shape == (B,)
    assert jnp.allclose(out1, ref, rtol=5e-4, atol=1e-1), (out1, ref)
    assert jnp.allclose(out2, ref, rtol=5e-4, atol=1e-1), (out2, ref)
    assert jnp.allclose(out3, ref_bf, rtol=5e-4, atol=1e-1), (out3, ref_bf)
    print("KERNEL_OK")
</pallas_src>

<mosaic_0001>
module attributes {stable_mosaic.version = 11 : i64} {
  func.func @_dar1_kernel(%arg0: i32, %arg1: i32, %arg2: memref<2x384xf32, #tpu.memory_space<vmem>>, %arg3: memref<2x384xf32, #tpu.memory_space<vmem>>, %arg4: memref<2x384xf32, #tpu.memory_space<vmem>>, %arg5: memref<2x128xf32, #tpu.memory_space<vmem>>, %arg6: memref<1xf32, #tpu.memory_space<smem>>, %arg7: memref<2x1xf32, #tpu.memory_space<vmem>>, %arg8: memref<2x1xf32, #tpu.memory_space<vmem>>, %arg9: memref<2x128xf32, #tpu.memory_space<vmem>>) attributes {dimension_semantics = [#tpu.dimension_semantics<parallel>, #tpu.dimension_semantics<arbitrary>], iteration_bounds = array<i64: 1, 1>, scalar_prefetch = 0 : i64, scratch_operands = 2 : i64, tpu.core_type = #tpu.core_type<tc>, window_params = [{transform_indices = @transform_0, window_bounds = array<i64: 2, 384>}, {pipeline_mode = #tpu.pipeline_mode<synchronous>, transform_indices = @transform_1, window_bounds = array<i64: 2, 384>}, {pipeline_mode = #tpu.pipeline_mode<synchronous>, transform_indices = @transform_2, window_bounds = array<i64: 2, 384>}, {pipeline_mode = #tpu.pipeline_mode<synchronous>, transform_indices = @transform_3, window_bounds = array<i64: 2, 128>}, {transform_indices = @transform_4, window_bounds = array<i64: 1>}, {transform_indices = @transform_5, window_bounds = array<i64: 2, 1>}]} {
    %c0_i32 = arith.constant 0 : i32
    %0 = arith.cmpi eq, %arg1, %c0_i32 : i32
    %1 = arith.extui %0 : i1 to i32
    %c0_i32_0 = arith.constant 0 : i32
    %2 = arith.cmpi ne, %1, %c0_i32_0 : i32
    scf.if %2 {
      %cst_15 = arith.constant 0.000000e+00 : f32
      %24 = vector.broadcast %cst_15 : f32 to vector<2x1xf32>
      %c0_16 = arith.constant 0 : index
      %c0_17 = arith.constant 0 : index
      %25 = vector.load %arg8[%c0_16, %c0_17] : memref<2x1xf32, #tpu.memory_space<vmem>>, vector<2x1xf32>
      tpu.vector_store %arg8[%c0_16, %c0_17], %24 {strides = array<i32>} : memref<2x1xf32, #tpu.memory_space<vmem>>, vector<2x1xf32>,
    } else {
    }
    %c0 = arith.constant 0 : index
    %c0_1 = arith.constant 0 : index
    %3 = vector.load %arg2[%c0, %c0_1] : memref<2x384xf32, #tpu.memory_space<vmem>>, vector<2x384xf32>
    %c0_2 = arith.constant 0 : index
    %c0_3 = arith.constant 0 : index
    %4 = vector.load %arg3[%c0_2, %c0_3] : memref<2x384xf32, #tpu.memory_space<vmem>>, vector<2x384xf32>
    %c0_4 = arith.constant 0 : index
    %c0_5 = arith.constant 0 : index
    %5 = vector.load %arg4[%c0_4, %c0_5] : memref<2x384xf32, #tpu.memory_space<vmem>>, vector<2x384xf32>
    %c4_i32 = arith.constant 4 : i32
    %6 = tpu.dynamic_rotate %3 by %c4_i32 dim 1 : vector<2x384xf32>, i32 -> vector<2x384xf32>
    %7 = arith.subf %3, %6 : vector<2x384xf32>
    %8 = arith.subf %7, %4 : vector<2x384xf32>
    %9 = arith.mulf %8, %5 : vector<2x384xf32>
    %10 = arith.mulf %9, %9 : vector<2x384xf32>
    %c0_i32_6 = arith.constant 0 : i32
    %11 = arith.cmpi slt, %arg1, %c0_i32_6 : i32
    %12 = arith.extui %11 : i1 to i32
    %c0_i32_7 = arith.constant 0 : i32
    %13 = arith.cmpi ne, %12, %c0_i32_7 : i32
    scf.if %13 {
      %c0_15 = arith.constant 0 : index
      %c0_16 = arith.constant 0 : index
      %24 = vector.load %arg8[%c0_15, %c0_16] : memref<2x1xf32, #tpu.memory_space<vmem>>, vector<2x1xf32>
      %cst_17 = arith.constant dense<0.000000e+00> : vector<2xf32>
      %25 = vector.multi_reduction <add>, %10, %cst_17 [1] : vector<2x384xf32> to vector<2xf32>
      %26 = vector.shape_cast %25 : vector<2xf32> to vector<2x1xf32>
      %27 = arith.addf %24, %26 : vector<2x1xf32>
      %c0_18 = arith.constant 0 : index
      %c0_19 = arith.constant 0 : index
      %28 = vector.load %arg8[%c0_18, %c0_19] : memref<2x1xf32, #tpu.memory_space<vmem>>, vector<2x1xf32>
      tpu.vector_store %arg8[%c0_18, %c0_19], %27 {strides = array<i32>} : memref<2x1xf32, #tpu.memory_space<vmem>>, vector<2x1xf32>,
    } else {
    }
    %c0_i32_8 = arith.constant 0 : i32
    %14 = arith.cmpi eq, %arg1, %c0_i32_8 : i32
    %15 = arith.extui %14 : i1 to i32
    %c0_i32_9 = arith.constant 0 : i32
    %16 = arith.cmpi ne, %15, %c0_i32_9 : i32
    scf.if %16 {
      %24 = tpu.iota {dimensions = array<i32: 1>} : vector<2x384xi32>
      %c4_i32_15 = arith.constant 4 : i32
      %25 = vector.broadcast %c4_i32_15 : i32 to vector<2x384xi32>
      %26 = arith.cmpi sge, %24, %25 : vector<2x384xi32>
      %c384_i32 = arith.constant 384 : i32
      %27 = arith.muli %arg1, %c384_i32 : i32
      %28 = vector.broadcast %27 : i32 to vector<2x384xi32>
      %29 = arith.addi %28, %24 : vector<2x384xi32>
      %c384_i32_16 = arith.constant 384 : i32
      %30 = vector.broadcast %c384_i32_16 : i32 to vector<2x384xi32>
      %31 = arith.cmpi slt, %29, %30 : vector<2x384xi32>
      %32 = arith.andi %26, %31 : vector<2x384xi1>
      %c0_17 = arith.constant 0 : index
      %c0_18 = arith.constant 0 : index
      %33 = vector.load %arg8[%c0_17, %c0_18] : memref<2x1xf32, #tpu.memory_space<vmem>>, vector<2x1xf32>
      %cst_19 = arith.constant 0.000000e+00 : f32
      %34 = vector.broadcast %cst_19 : f32 to vector<2x384xf32>
      %35 = arith.select %32, %10, %34 : vector<2x384xi1>, vector<2x384xf32>
      %cst_20 = arith.constant dense<0.000000e+00> : vector<2xf32>
      %36 = vector.multi_reduction <add>, %35, %cst_20 [1] : vector<2x384xf32> to vector<2xf32>
      %37 = vector.shape_cast %36 : vector<2xf32> to vector<2x1xf32>
      %38 = arith.addf %33, %37 : vector<2x1xf32>
      %c0_21 = arith.constant 0 : index
      %c0_22 = arith.constant 0 : index
      %39 = vector.load %arg8[%c0_21, %c0_22] : memref<2x1xf32, #tpu.memory_space<vmem>>, vector<2x1xf32>
      tpu.vector_store %arg8[%c0_21, %c0_22], %38 {strides = array<i32>} : memref<2x1xf32, #tpu.memory_space<vmem>>, vector<2x1xf32>,
    } else {
    }
    %c0_10 = arith.constant 0 : index
    %c0_11 = arith.constant 0 : index
    %17 = vector.load %arg8[%c0_10, %c0_11] : memref<2x1xf32, #tpu.memory_space<vmem>>, vector<2x1xf32>
    %cst = arith.constant -5.000000e-01 : f32
    %18 = vector.broadcast %cst : f32 to vector<2x1xf32>
    %19 = arith.mulf %18, %17 : vector<2x1xf32>
    %c0_12 = arith.constant 0 : index
    %20 = memref.load %arg6[%c0_12] : memref<1xf32, #tpu.memory_space<smem>>
    %21 = vector.broadcast %20 : f32 to vector<2x1xf32>
    %22 = arith.addf %19, %21 : vector<2x1xf32>
    %c0_13 = arith.constant 0 : index
    %c0_14 = arith.constant 0 : index
    %23 = vector.load %arg7[%c0_13, %c0_14] : memref<2x1xf32, #tpu.memory_space<vmem>>, vector<2x1xf32>
    tpu.vector_store %arg7[%c0_13, %c0_14], %22 {strides = array<i32>} : memref<2x1xf32, #tpu.memory_space<vmem>>, vector<2x1xf32>,
    return
  }
  func.func @transform_0(%arg0: i32, %arg1: i32) -> (i32, i32) {
    %c0_i32 = arith.constant 0 : i32
    return %arg0, %arg1 : i32, i32
  }
  func.func @transform_1(%arg0: i32, %arg1: i32) -> (i32, i32) {
    %c0_i32 = arith.constant 0 : i32
    %c0_i32_0 = arith.constant 0 : i32
    %c0_i32_1 = arith.constant 0 : i32
    return %c0_i32, %c0_i32_0 : i32, i32
  }
  func.func @transform_2(%arg0: i32, %arg1: i32) -> (i32, i32) {
    %c0_i32 = arith.constant 0 : i32
    %c0_i32_0 = arith.constant 0 : i32
    %c0_i32_1 = arith.constant 0 : i32
    return %c0_i32, %c0_i32_0 : i32, i32
  }
  func.func @transform_3(%arg0: i32, %arg1: i32) -> (i32, i32) {
    %c0_i32 = arith.constant 0 : i32
    %c0_i32_0 = arith.constant 0 : i32
    %c0_i32_1 = arith.constant 0 : i32
    return %c0_i32, %c0_i32_0 : i32, i32
  }
  func.func @transform_4(%arg0: i32, %arg1: i32) -> i32 {
    %c0_i32 = arith.constant 0 : i32
    %c0_i32_0 = arith.constant 0 : i32
    return %c0_i32 : i32
  }
  func.func @transform_5(%arg0: i32, %arg1: i32) -> (i32, i32) {
    %c0_i32 = arith.constant 0 : i32
    %c0_i32_0 = arith.constant 0 : i32
    return %arg0, %c0_i32 : i32, i32
  }
}

</mosaic_0001>

<bundles_post_ra>
// kernel: tpu_custom_call.1
= control target key start
LH: loop header
LB: loop body
LE: loop exit
PB: predicated region body
PF: predicated region fallthrough
CT: control target
= control target key end

     0   :  { %11 = vsyncpa [#allocation6], 0  ;;  %s320_s0 = inlined_call_operand.hbm [shape: f32[2,384], index: 0, kind: input, shape index: {}]   ;;  %s321_s1 = inlined_call_operand.hbm [shape: f32[2,384], index: 1, kind: input, shape index: {}]   ;;  %s322_s2 = inlined_call_operand.hbm [shape: f32[2,384], index: 2, kind: input, shape index: {}]   ;;  %s323_s3 = inlined_call_operand.vmem [shape: f32[2,128], index: 3, kind: input, shape index: {}]   ;;  %s324_s4 = inlined_call_operand.<no memory space> [shape: f32[1], index: 4, kind: input, shape index: {}]   ;;  %s325_s5 = inlined_call_operand.vmem [shape: f32[2,1], index: 5, kind: output, shape index: {}]  }
   0x1   :  { %12 = vsyncpa [#allocation8], 0  ;;  %s29_s20 = sshll.u32 %s321_s1, 4  ;;  %s263_s21 = smov [#allocation7]   ;;  %s30_s20 = int_to_ptr.hbm [resolvable:$true] %s29_s20 }
   0x2   :  { %s31_s22 = sshll.u32 %s263_s21, 4  ;;  %s18_s3 = sshll.u32 %s320_s0, 4  ;;  %s32_s22 = int_to_ptr.vmem [resolvable:$true] %s31_s22  ;;  %s19_s3 = int_to_ptr.hbm [resolvable:$true] %s18_s3 }
   0x3   :  { %34 = dma.hbm_to_vmem [thread:$0]  %s30_s20, 96, %s32_s22, [#allocation8]  }
   0x4   :  { %s264_s25 = smov [#allocation5]   ;;  %s40_s29 = sshll.u32 %s322_s2, 4  ;;  %s41_s29 = int_to_ptr.hbm [resolvable:$true] %s40_s29 }
   0x5   :  { %s20_s26 = sshll.u32 %s264_s25, 4  ;;  %s265_s1 = smov [#allocation9]   ;;  %s21_s26 = int_to_ptr.vmem [resolvable:$true] %s20_s26 }
   0x6   :  { %23 = dma.hbm_to_vmem [thread:$0]  %s19_s3, 96, %s21_s26, [#allocation6]  }
   0x7   :  { %s42_s30 = sshll.u32 %s265_s1, 4  ;;  %s43_s30 = int_to_ptr.vmem [resolvable:$true] %s42_s30 }
   0x8   :  { %45 = dma.hbm_to_vmem [thread:$0]  %s41_s29, 96, %s43_s30, [#allocation8]  }
   0x9   :  { %259 = dma.done.wait [#allocation6], 96  }
   0xa   :  { %260 = vsyncadd [#allocation6], 4294967200 }
   0xb   :  { %261 = dma.done.wait [#allocation8], 192  }
   0xc   :  { %262 = vsyncadd [#allocation8], 4294967104  ;;  %v68_v0 = vld [vmem:[#allocation5] sm:$0x3f]  ;;  %s266_s0 = smov 4   ;;  %v85_v4 = vlaneseq  ;;  %vm66_vm0 = vcmask 1024   ;;  %v172_v35 = vstv %s324_s4 }
   0xd   :  { %72 = vst [vmem:[#allocation1] ss:$4 sm:$0xff] %v68_v0  ;;  %v267_v7 = vmov 0.0   ;;  %vm96_vm2 = vcmask 1041408   ;;  %vm98_vm3 = vcmask 1043456  }
   0xe   :  { %v86_v6 = vand.u32 127, %v85_v4  ;;  %67 = vst.msk [vmem:[#allocation2] sm:$0x3] %vm66_vm0, %v267_v7  ;;  %v69_v16 = vld [vmem:[#allocation7] sm:$0x3f] }
   0xf   :  { %v70_v19 = vld [vmem:[#allocation9] sm:$0x3f] }
  0x10   :  { %vm87_vm1 = vcmp.lt.s32.totalorder %v86_v6, 4  ;;  %vm133_vm4 = vcmp.ge.s32.totalorder %v86_v6, 4 }
  0x14   :  { %v75_v1 = vld.sshfl [vmem:[#allocation1 + $0x10] sm:$0xff pattern:$0x73625140]  ;;  %v73_v2 = vld.sshfl [vmem:[#allocation1] sm:$0xff pattern:$0x73625140] }
  0x15   :  { %83 = vrot.lane.b32.xlu1 %v75_v1, %s266_s0  ;;  %79 = vrot.lane.b32.xlu0 %v73_v2, %s266_s0  ;;  %v74_v3 = vld.sshfl [vmem:[#allocation1 + $0x8] sm:$0xff pattern:$0x73625140] }
  0x16   :  { %v147_v32 = vld [vmem:[#allocation2] sm:$0x3] }
  0x1d   :  { %81 = vrot.lane.b32.xlu0 %v74_v3, %s266_s0 }
  0x87   :  { %v80_v5 = vpop.permute.xlu0 %79  ;;  %v84_v8 = vpop.permute.xlu1 %83 }
  0x88   :  { %v90_v14 = vsel %vm87_vm1, %v84_v8, %v80_v5 }
  0x8f   :  { %v82_v9 = vpop.permute.xlu0 %81 }
  0x90   :  { %v88_v10 = vsel %vm87_vm1, %v82_v9, %v84_v8  ;;  %v89_v11 = vsel %vm87_vm1, %v80_v5, %v82_v9 }
  0x91   :  { %v94_v12 = vrot.slane %v89_v11, 6  ;;  %v95_v13 = vrot.slane %v88_v10, 4 }
  0x93   :  { %v97_v15 = vsel %vm96_vm2, %v90_v14, %v94_v12 }
  0x94   :  { %v99_v17 = vsel %vm98_vm3, %v97_v15, %v95_v13 }
  0x95   :  { %v101_v18 = vsub.f32 %v68_v0, %v99_v17 }
  0x97   :  { %v102_v20 = vsub.f32 %v101_v18, %v69_v16 }
  0x99   :  { %v103_v21 = vmul.f32 %v102_v20, %v70_v19 }
  0x9b   :  { %v104_v22 = vmul.f32 %v103_v21, %v103_v21 }
  0x9d   :  { %149 = vst [vmem:[#allocation1] ss:$4 sm:$0xff] %v104_v22 }
  0xa4   :  { %v150_v23 = vld.sshfl [vmem:[#allocation1] sm:$0xff pattern:$0x73625140]  ;;  %v151_v24 = vld.sshfl [vmem:[#allocation1 + $0x8] sm:$0xff pattern:$0x73625140] }
  0xa5   :  { %v152_v25 = vld.sshfl [vmem:[#allocation1 + $0x10] sm:$0xff pattern:$0x73625140]  ;;  %v156_v26 = vsel %vm133_vm4, %v150_v23, 0.0  ;;  %v160_v27 = vsel %vm96_vm2, %v151_v24, 0.0 }
  0xa6   :  { %v159_v28 = vsel %vm96_vm2, %v156_v26, 0.0  ;;  %v162_v30 = vsel %vm96_vm2, %v152_v25, 0.0 }
  0xa7   :  { %v161_v29 = vadd.f32 %v160_v27, %v159_v28 }
  0xa9   :  { %v163_v31 = vadd.f32 %v162_v30, %v161_v29 }
  0xab   :  { %164 = vadd.xlane.f32.xlu1 %v163_v31 }
 0x11e   :  { %v165_v33 = vpop.xlane.xlu1 %164 }
 0x11f   :  { %v166_v34 = vadd.f32 %v165_v33, %v147_v32 }
 0x121   :  { %168 = vst.msk [vmem:[#allocation2] sm:$0x3] %vm66_vm0, %v166_v34 }
 0x128   :  { %v169_v36 = vld [vmem:[#allocation2] sm:$0x3] }
 0x129   :  { %v170_v37 = vmul.f32 -0.5, %v169_v36 }
 0x12b   :  { %v173_v38 = vadd.f32 %v172_v35, %v170_v37 }
 0x12d   :  { %175 = vst.msk [vmem:[%s325_s5] sm:$0x3] %vm66_vm0, %v173_v38 }
 0x12e   :  { %180 = vsyncpa [#allocation6], 1 }
 0x12f   :  { %181 = vsyncpa [#allocation8], 1 }

</bundles_post_ra>
